<compile_context>
chip_gen: v7x
topology: tpu7x:2x2x1
jax: 0.10.0
libtpu: 0.0.40
codegen_flags: <defaults>
</compile_context>

<pallas_src>
import functools

import jax
import jax.numpy as jnp
from jax import lax
from jax.experimental import pallas as pl
from jax.experimental.pallas import tpu as pltpu

CONCAT_DIM = 64
PRED_DIM1 = 64
PRED_DIM2 = 64
PRED_DIM3 = 64
OUT_DIM = 1
BN_EPS = 1e-5


def _round_up(v, m):
    return (v + m - 1) // m * m


def fclayer_kernel(x_ref,
                   w1_ref, b1_ref, g1_ref, be1_ref,
                   w2_ref, b2_ref, g2_ref, be2_ref,
                   w3_ref, b3_ref,
                   w4_ref, b4_ref,
                   o_ref,
                   sum1_ref, sq1_ref, sum2_ref, sq2_ref,
                   *, n_valid, tile_n):
    phase = pl.program_id(0)   # 0: bn1 stats, 1: bn2 stats, 2: final output
    tile = pl.program_id(1)    # batch tile

    @pl.when(jnp.logical_and(phase == 0, tile == 0))
    def _init():
        sum1_ref[...] = jnp.zeros_like(sum1_ref)
        sq1_ref[...] = jnp.zeros_like(sq1_ref)
        sum2_ref[...] = jnp.zeros_like(sum2_ref)
        sq2_ref[...] = jnp.zeros_like(sq2_ref)

    # Row-validity mask for a (possibly zero-padded) last tile: padded rows must
    # not contribute to the BatchNorm statistics.
    row = tile * tile_n + lax.broadcasted_iota(jnp.int32, (tile_n, 1), 0)
    valid = (row < n_valid).astype(jnp.float32)
    inv_n = jnp.float32(1.0 / n_valid)

    # fc1 + relu (recomputed every phase; x is re-streamed, weights resident).
    # x may be bf16 (bandwidth-optimized path) -> MXU takes it natively; the
    # accumulation and everything downstream is f32.
    z1 = jnp.dot(x_ref[...], w1_ref[...],
                 preferred_element_type=jnp.float32) + b1_ref[...]
    z1 = jnp.maximum(z1, 0.0)

    @pl.when(phase == 0)
    def _stats1():
        z1m = z1 * valid
        sum1_ref[...] += jnp.sum(z1m, axis=0, keepdims=True)
        sq1_ref[...] += jnp.sum(z1m * z1m, axis=0, keepdims=True)

    @pl.when(phase >= 1)
    def _rest():
        # bn1 with exact full-batch (biased) statistics, fused scale/shift form.
        mean1 = sum1_ref[...] * inv_n
        var1 = sq1_ref[...] * inv_n - mean1 * mean1
        scale1 = lax.rsqrt(var1 + BN_EPS) * g1_ref[...]
        shift1 = be1_ref[...] - mean1 * scale1
        h1 = z1 * scale1 + shift1

        # fc2 + relu
        z2 = jnp.dot(h1, w2_ref[...],
                     preferred_element_type=jnp.float32) + b2_ref[...]
        z2 = jnp.maximum(z2, 0.0)

        @pl.when(phase == 1)
        def _stats2():
            z2m = z2 * valid
            sum2_ref[...] += jnp.sum(z2m, axis=0, keepdims=True)
            sq2_ref[...] += jnp.sum(z2m * z2m, axis=0, keepdims=True)

        @pl.when(phase == 2)
        def _final():
            # bn2
            mean2 = sum2_ref[...] * inv_n
            var2 = sq2_ref[...] * inv_n - mean2 * mean2
            scale2 = lax.rsqrt(var2 + BN_EPS) * g2_ref[...]
            shift2 = be2_ref[...] - mean2 * scale2
            h2 = z2 * scale2 + shift2

            # fc3 + relu  (dropout with p=0.0 / eval mode is the identity)
            z3 = jnp.dot(h2, w3_ref[...],
                         preferred_element_type=jnp.float32) + b3_ref[...]
            z3 = jnp.maximum(z3, 0.0)

            # fc4: width-1 output -> VPU multiply + lane reduction (skip MXU).
            out = jnp.sum(z3 * w4_ref[...], axis=-1, keepdims=True) + b4_ref[...]
            o_ref[...] = out.astype(o_ref.dtype)


def fclayer_forward(x, params, *, tile_n=512, input_dtype=None):
    """Fused FClayer forward with exact full-batch training-mode BatchNorm."""
    n, d = x.shape
    assert d == CONCAT_DIM

    w1 = params["w1"]
    if input_dtype is not None:
        # Bandwidth optimization: stream x (and the fc1 MXU operands) narrow;
        # all BN/ReLU math stays f32 inside the kernel.
        x = x.astype(input_dtype)
        w1 = w1.astype(input_dtype)

    # Pick the batch tile: large (default 512) to amortize per-step overhead and
    # MXU fill/drain, clamped for small batches; must be a multiple of 8.
    tile_n = max(8, min(int(tile_n), _round_up(n, 8)))
    tile_n = _round_up(tile_n, 8)
    n_pad = _round_up(n, tile_n)
    num_tiles = n_pad // tile_n
    if n_pad != n:
        x = jnp.pad(x, ((0, n_pad - n), (0, 0)))

    def resident(arr):
        # Constant index map -> fetched once, stays VMEM-resident across grid.
        return pl.BlockSpec(arr.shape, lambda p, i: (0, 0))

    weight_args = (w1, params["b1"], params["g1"], params["be1"],
                   params["w2"], params["b2"], params["g2"], params["be2"],
                   params["w3"], params["b3"],
                   params["w4"], params["b4"])

    kernel = functools.partial(fclayer_kernel, n_valid=n, tile_n=tile_n)

    out = pl.pallas_call(
        kernel,
        out_shape=jax.ShapeDtypeStruct((n_pad, OUT_DIM), jnp.float32),
        grid=(3, num_tiles),
        in_specs=[pl.BlockSpec((tile_n, CONCAT_DIM), lambda p, i: (i, 0))]
                 + [resident(a) for a in weight_args],
        out_specs=pl.BlockSpec((tile_n, OUT_DIM), lambda p, i: (i, 0)),
        scratch_shapes=[pltpu.VMEM((1, PRED_DIM1), jnp.float32),   # bn1 sum
                        pltpu.VMEM((1, PRED_DIM1), jnp.float32),   # bn1 sumsq
                        pltpu.VMEM((1, PRED_DIM2), jnp.float32),   # bn2 sum
                        pltpu.VMEM((1, PRED_DIM2), jnp.float32)],  # bn2 sumsq
        compiler_params=pltpu.CompilerParams(
            # Both axes are sequential: phases depend on the stats scratch and
            # batch tiles accumulate into it (exact full-batch BN statistics).
            dimension_semantics=("arbitrary", "arbitrary"),
        ),
    )(x, *weight_args)

    return out[:n]


def init_params(key):
    ks = jax.random.split(key, 8)

    def linear(kw, kb, fan_in, fan_out, transpose=True):
        bound = 1.0 / (fan_in ** 0.5)
        if transpose:  # stored (in_features, out_features) for x @ W
            w = jax.random.uniform(kw, (fan_in, fan_out), jnp.float32, -bound, bound)
        else:          # stored (out_features, in_features) = PyTorch layout
            w = jax.random.uniform(kw, (fan_out, fan_in), jnp.float32, -bound, bound)
        b = jax.random.uniform(kb, (1, fan_out), jnp.float32, -bound, bound)
        return w, b

    w1, b1 = linear(ks[0], ks[1], CONCAT_DIM, PRED_DIM1)
    w2, b2 = linear(ks[2], ks[3], PRED_DIM1, PRED_DIM2)
    w3, b3 = linear(ks[4], ks[5], PRED_DIM2, PRED_DIM3)
    # fc4 kept as a (1, 64) row (PyTorch layout) for the VPU mul + lane-reduce.
    w4, b4 = linear(ks[6], ks[7], PRED_DIM3, OUT_DIM, transpose=False)

    return {
        "w1": w1, "b1": b1,
        "g1": jnp.ones((1, PRED_DIM1), jnp.float32),
        "be1": jnp.zeros((1, PRED_DIM1), jnp.float32),
        "w2": w2, "b2": b2,
        "g2": jnp.ones((1, PRED_DIM2), jnp.float32),
        "be2": jnp.zeros((1, PRED_DIM2), jnp.float32),
        "w3": w3, "b3": b3,
        "w4": w4, "b4": b4,
    }


def _reference(x, p):
    def bn(h, g, b):
        m = jnp.mean(h, axis=0, keepdims=True)
        v = jnp.mean((h - m) ** 2, axis=0, keepdims=True)
        return (h - m) / jnp.sqrt(v + BN_EPS) * g + b

    h1 = bn(jnp.maximum(x @ p["w1"] + p["b1"], 0.0), p["g1"], p["be1"])
    h2 = bn(jnp.maximum(h1 @ p["w2"] + p["b2"], 0.0), p["g2"], p["be2"])
    h3 = jnp.maximum(h2 @ p["w3"] + p["b3"], 0.0)
    return jnp.sum(h3 * p["w4"], axis=-1, keepdims=True) + p["b4"]


if __name__ == "__main__":
    key = jax.random.PRNGKey(0)
    kx, kp = jax.random.split(key)

    N = 200  # deliberately not a multiple of the tile to exercise masking
    x = jax.random.normal(kx, (N, CONCAT_DIM), dtype=jnp.float32)
    params = init_params(kp)
    ref = _reference(x, params)

    # f32 path (bit-faithful to the PyTorch module), small tile to exercise
    # multiple batch tiles + partial-tile masking.
    out = fclayer_forward(x, params, tile_n=64)
    out = jax.block_until_ready(out)
    assert out.shape == (N, OUT_DIM)
    assert jnp.allclose(out, ref, atol=1e-4, rtol=1e-4)

    # Bandwidth-optimized path: stream x / fc1 operands in bf16 (looser check).
    out_bf16 = fclayer_forward(x, params, tile_n=64, input_dtype=jnp.bfloat16)
    out_bf16 = jax.block_until_ready(out_bf16)
    assert out_bf16.shape == (N, OUT_DIM)
    assert jnp.allclose(out_bf16, ref, atol=1e-1, rtol=1e-1)

    print("KERNEL_OK")
</pallas_src>

<mosaic_0001>
module attributes {stable_mosaic.version = 11 : i64} {
  func.func @fclayer_kernel(%arg0: i32, %arg1: i32, %arg2: memref<64x64xf32, #tpu.memory_space<vmem>>, %arg3: memref<64x64xf32, #tpu.memory_space<vmem>>, %arg4: memref<1x64xf32, #tpu.memory_space<vmem>>, %arg5: memref<1x64xf32, #tpu.memory_space<vmem>>, %arg6: memref<1x64xf32, #tpu.memory_space<vmem>>, %arg7: memref<64x64xf32, #tpu.memory_space<vmem>>, %arg8: memref<1x64xf32, #tpu.memory_space<vmem>>, %arg9: memref<1x64xf32, #tpu.memory_space<vmem>>, %arg10: memref<1x64xf32, #tpu.memory_space<vmem>>, %arg11: memref<64x64xf32, #tpu.memory_space<vmem>>, %arg12: memref<1x64xf32, #tpu.memory_space<vmem>>, %arg13: memref<1x64xf32, #tpu.memory_space<vmem>>, %arg14: memref<1x1xf32, #tpu.memory_space<vmem>>, %arg15: memref<64x1xf32, #tpu.memory_space<vmem>>, %arg16: memref<1x64xf32, #tpu.memory_space<vmem>>, %arg17: memref<1x64xf32, #tpu.memory_space<vmem>>, %arg18: memref<1x64xf32, #tpu.memory_space<vmem>>, %arg19: memref<1x64xf32, #tpu.memory_space<vmem>>) attributes {dimension_semantics = [#tpu.dimension_semantics<arbitrary>, #tpu.dimension_semantics<arbitrary>], iteration_bounds = array<i64: 3, 4>, scalar_prefetch = 0 : i64, scratch_operands = 4 : i64, tpu.core_type = #tpu.core_type<tc>, window_params = [{transform_indices = @transform_0, window_bounds = array<i64: 64, 64>}, {pipeline_mode = #tpu.pipeline_mode<synchronous>, transform_indices = @transform_1, window_bounds = array<i64: 64, 64>}, {pipeline_mode = #tpu.pipeline_mode<synchronous>, transform_indices = @transform_2, window_bounds = array<i64: 1, 64>}, {pipeline_mode = #tpu.pipeline_mode<synchronous>, transform_indices = @transform_3, window_bounds = array<i64: 1, 64>}, {pipeline_mode = #tpu.pipeline_mode<synchronous>, transform_indices = @transform_4, window_bounds = array<i64: 1, 64>}, {pipeline_mode = #tpu.pipeline_mode<synchronous>, transform_indices = @transform_5, window_bounds = array<i64: 64, 64>}, {pipeline_mode = #tpu.pipeline_mode<synchronous>, transform_indices = @transform_6, window_bounds = array<i64: 1, 64>}, {pipeline_mode = #tpu.pipeline_mode<synchronous>, transform_indices = @transform_7, window_bounds = array<i64: 1, 64>}, {pipeline_mode = #tpu.pipeline_mode<synchronous>, transform_indices = @transform_8, window_bounds = array<i64: 1, 64>}, {pipeline_mode = #tpu.pipeline_mode<synchronous>, transform_indices = @transform_9, window_bounds = array<i64: 64, 64>}, {pipeline_mode = #tpu.pipeline_mode<synchronous>, transform_indices = @transform_10, window_bounds = array<i64: 1, 64>}, {pipeline_mode = #tpu.pipeline_mode<synchronous>, transform_indices = @transform_11, window_bounds = array<i64: 1, 64>}, {pipeline_mode = #tpu.pipeline_mode<synchronous>, transform_indices = @transform_12, window_bounds = array<i64: 1, 1>}, {transform_indices = @transform_13, window_bounds = array<i64: 64, 1>}]} {
    %c0_i32 = arith.constant 0 : i32
    %0 = arith.cmpi eq, %arg0, %c0_i32 : i32
    %c0_i32_0 = arith.constant 0 : i32
    %1 = arith.cmpi eq, %arg1, %c0_i32_0 : i32
    %2 = arith.andi %0, %1 : i1
    %3 = arith.extui %2 : i1 to i32
    %c0_i32_1 = arith.constant 0 : i32
    %4 = arith.cmpi ne, %3, %c0_i32_1 : i32
    scf.if %4 {
      %cst_12 = arith.constant 0.000000e+00 : f32
      %27 = vector.broadcast %cst_12 : f32 to vector<1x64xf32>
      %c0_13 = arith.constant 0 : index
      %c0_14 = arith.constant 0 : index
      %28 = vector.load %arg16[%c0_13, %c0_14] : memref<1x64xf32, #tpu.memory_space<vmem>>, vector<1x64xf32>
      tpu.vector_store %arg16[%c0_13, %c0_14], %27 {strides = array<i32>} : memref<1x64xf32, #tpu.memory_space<vmem>>, vector<1x64xf32>,
      %cst_15 = arith.constant 0.000000e+00 : f32
      %29 = vector.broadcast %cst_15 : f32 to vector<1x64xf32>
      %c0_16 = arith.constant 0 : index
      %c0_17 = arith.constant 0 : index
      %30 = vector.load %arg17[%c0_16, %c0_17] : memref<1x64xf32, #tpu.memory_space<vmem>>, vector<1x64xf32>
      tpu.vector_store %arg17[%c0_16, %c0_17], %29 {strides = array<i32>} : memref<1x64xf32, #tpu.memory_space<vmem>>, vector<1x64xf32>,
      %cst_18 = arith.constant 0.000000e+00 : f32
      %31 = vector.broadcast %cst_18 : f32 to vector<1x64xf32>
      %c0_19 = arith.constant 0 : index
      %c0_20 = arith.constant 0 : index
      %32 = vector.load %arg18[%c0_19, %c0_20] : memref<1x64xf32, #tpu.memory_space<vmem>>, vector<1x64xf32>
      tpu.vector_store %arg18[%c0_19, %c0_20], %31 {strides = array<i32>} : memref<1x64xf32, #tpu.memory_space<vmem>>, vector<1x64xf32>,
      %cst_21 = arith.constant 0.000000e+00 : f32
      %33 = vector.broadcast %cst_21 : f32 to vector<1x64xf32>
      %c0_22 = arith.constant 0 : index
      %c0_23 = arith.constant 0 : index
      %34 = vector.load %arg19[%c0_22, %c0_23] : memref<1x64xf32, #tpu.memory_space<vmem>>, vector<1x64xf32>
      tpu.vector_store %arg19[%c0_22, %c0_23], %33 {strides = array<i32>} : memref<1x64xf32, #tpu.memory_space<vmem>>, vector<1x64xf32>,
    } else {
    }
    %c64_i32 = arith.constant 64 : i32
    %5 = arith.muli %arg1, %c64_i32 : i32
    %6 = tpu.iota {dimensions = array<i32: 0>} : vector<64x1xi32>
    %7 = vector.broadcast %5 : i32 to vector<64x1xi32>
    %8 = arith.addi %7, %6 : vector<64x1xi32>
    %c200_i32 = arith.constant 200 : i32
    %9 = vector.broadcast %c200_i32 : i32 to vector<64x1xi32>
    %10 = arith.cmpi slt, %8, %9 : vector<64x1xi32>
    %11 = arith.extui %10 : vector<64x1xi1> to vector<64x1xi32>
    %12 = arith.sitofp %11 : vector<64x1xi32> to vector<64x1xf32>
    %c0 = arith.constant 0 : index
    %c0_2 = arith.constant 0 : index
    %13 = vector.load %arg2[%c0, %c0_2] : memref<64x64xf32, #tpu.memory_space<vmem>>, vector<64x64xf32>
    %c0_3 = arith.constant 0 : index
    %c0_4 = arith.constant 0 : index
    %14 = vector.load %arg3[%c0_3, %c0_4] : memref<64x64xf32, #tpu.memory_space<vmem>>, vector<64x64xf32>
    %cst = arith.constant dense<0.000000e+00> : vector<64x64xf32>
    %15 = tpu.matmul %13, %14, %cst {dimension_numbers = #tpu.dot_dimension_numbers<[1], [0], [0], [1], [0, 0, 1, 1], [], []>} : vector<64x64xf32>, vector<64x64xf32>, vector<64x64xf32> -> vector<64x64xf32>
    %c0_5 = arith.constant 0 : index
    %c0_6 = arith.constant 0 : index
    %16 = vector.load %arg4[%c0_5, %c0_6] : memref<1x64xf32, #tpu.memory_space<vmem>>, vector<1x64xf32>
    %17 = vector.broadcast %16 : vector<1x64xf32> to vector<64x64xf32>
    %18 = arith.addf %15, %17 : vector<64x64xf32>
    %cst_7 = arith.constant 0.000000e+00 : f32
    %19 = vector.broadcast %cst_7 : f32 to vector<64x64xf32>
    %20 = arith.maximumf %18, %19 : vector<64x64xf32>
    %c0_i32_8 = arith.constant 0 : i32
    %21 = arith.cmpi eq, %arg0, %c0_i32_8 : i32
    %22 = arith.extui %21 : i1 to i32
    %c0_i32_9 = arith.constant 0 : i32
    %23 = arith.cmpi ne, %22, %c0_i32_9 : i32
    scf.if %23 {
      %27 = vector.broadcast %12 : vector<64x1xf32> to vector<64x64xf32>
      %28 = arith.mulf %20, %27 : vector<64x64xf32>
      %c0_12 = arith.constant 0 : index
      %c0_13 = arith.constant 0 : index
      %29 = vector.load %arg16[%c0_12, %c0_13] : memref<1x64xf32, #tpu.memory_space<vmem>>, vector<1x64xf32>
      %cst_14 = arith.constant dense<0.000000e+00> : vector<64xf32>
      %30 = vector.multi_reduction <add>, %28, %cst_14 [0] : vector<64x64xf32> to vector<64xf32>
      %31 = vector.shape_cast %30 : vector<64xf32> to vector<1x64xf32>
      %32 = arith.addf %29, %31 : vector<1x64xf32>
      %c0_15 = arith.constant 0 : index
      %c0_16 = arith.constant 0 : index
      %33 = vector.load %arg16[%c0_15, %c0_16] : memref<1x64xf32, #tpu.memory_space<vmem>>, vector<1x64xf32>
      tpu.vector_store %arg16[%c0_15, %c0_16], %32 {strides = array<i32>} : memref<1x64xf32, #tpu.memory_space<vmem>>, vector<1x64xf32>,
      %c0_17 = arith.constant 0 : index
      %c0_18 = arith.constant 0 : index
      %34 = vector.load %arg17[%c0_17, %c0_18] : memref<1x64xf32, #tpu.memory_space<vmem>>, vector<1x64xf32>
      %35 = arith.mulf %28, %28 : vector<64x64xf32>
      %cst_19 = arith.constant dense<0.000000e+00> : vector<64xf32>
      %36 = vector.multi_reduction <add>, %35, %cst_19 [0] : vector<64x64xf32> to vector<64xf32>
      %37 = vector.shape_cast %36 : vector<64xf32> to vector<1x64xf32>
      %38 = arith.addf %34, %37 : vector<1x64xf32>
      %c0_20 = arith.constant 0 : index
      %c0_21 = arith.constant 0 : index
      %39 = vector.load %arg17[%c0_20, %c0_21] : memref<1x64xf32, #tpu.memory_space<vmem>>, vector<1x64xf32>
      tpu.vector_store %arg17[%c0_20, %c0_21], %38 {strides = array<i32>} : memref<1x64xf32, #tpu.memory_space<vmem>>, vector<1x64xf32>,
    } else {
    }
    %c1_i32 = arith.constant 1 : i32
    %24 = arith.cmpi sge, %arg0, %c1_i32 : i32
    %25 = arith.extui %24 : i1 to i32
    %cst_10 = arith.constant 5.000000e-03 : f32
    %c0_i32_11 = arith.constant 0 : i32
    %26 = arith.cmpi ne, %25, %c0_i32_11 : i32
    scf.if %26 {
      %c0_12 = arith.constant 0 : index
      %c0_13 = arith.constant 0 : index
      %27 = vector.load %arg16[%c0_12, %c0_13] : memref<1x64xf32, #tpu.memory_space<vmem>>, vector<1x64xf32>
      %28 = vector.broadcast %cst_10 : f32 to vector<1x64xf32>
      %29 = arith.mulf %27, %28 : vector<1x64xf32>
      %c0_14 = arith.constant 0 : index
      %c0_15 = arith.constant 0 : index
      %30 = vector.load %arg17[%c0_14, %c0_15] : memref<1x64xf32, #tpu.memory_space<vmem>>, vector<1x64xf32>
      %31 = vector.broadcast %cst_10 : f32 to vector<1x64xf32>
      %32 = arith.mulf %30, %31 : vector<1x64xf32>
      %33 = arith.mulf %29, %29 : vector<1x64xf32>
      %34 = arith.subf %32, %33 : vector<1x64xf32>
      %cst_16 = arith.constant 9.99999974E-6 : f32
      %35 = vector.broadcast %cst_16 : f32 to vector<1x64xf32>
      %36 = arith.addf %34, %35 : vector<1x64xf32>
      %37 = math.rsqrt %36 : vector<1x64xf32>
      %c0_17 = arith.constant 0 : index
      %c0_18 = arith.constant 0 : index
      %38 = vector.load %arg5[%c0_17, %c0_18] : memref<1x64xf32, #tpu.memory_space<vmem>>, vector<1x64xf32>
      %39 = arith.mulf %37, %38 : vector<1x64xf32>
      %c0_19 = arith.constant 0 : index
      %c0_20 = arith.constant 0 : index
      %40 = vector.load %arg6[%c0_19, %c0_20] : memref<1x64xf32, #tpu.memory_space<vmem>>, vector<1x64xf32>
      %41 = arith.mulf %29, %39 : vector<1x64xf32>
      %42 = arith.subf %40, %41 : vector<1x64xf32>
      %43 = vector.broadcast %39 : vector<1x64xf32> to vector<64x64xf32>
      %44 = arith.mulf %20, %43 : vector<64x64xf32>
      %45 = vector.broadcast %42 : vector<1x64xf32> to vector<64x64xf32>
      %46 = arith.addf %44, %45 : vector<64x64xf32>
      %c0_21 = arith.constant 0 : index
      %c0_22 = arith.constant 0 : index
      %47 = vector.load %arg7[%c0_21, %c0_22] : memref<64x64xf32, #tpu.memory_space<vmem>>, vector<64x64xf32>
      %cst_23 = arith.constant dense<0.000000e+00> : vector<64x64xf32>
      %48 = tpu.matmul %46, %47, %cst_23 {dimension_numbers = #tpu.dot_dimension_numbers<[1], [0], [0], [1], [0, 0, 1, 1], [], []>} : vector<64x64xf32>, vector<64x64xf32>, vector<64x64xf32> -> vector<64x64xf32>
      %c0_24 = arith.constant 0 : index
      %c0_25 = arith.constant 0 : index
      %49 = vector.load %arg8[%c0_24, %c0_25] : memref<1x64xf32, #tpu.memory_space<vmem>>, vector<1x64xf32>
      %50 = vector.broadcast %49 : vector<1x64xf32> to vector<64x64xf32>
      %51 = arith.addf %48, %50 : vector<64x64xf32>
      %cst_26 = arith.constant 0.000000e+00 : f32
      %52 = vector.broadcast %cst_26 : f32 to vector<64x64xf32>
      %53 = arith.maximumf %51, %52 : vector<64x64xf32>
      %c1_i32_27 = arith.constant 1 : i32
      %54 = arith.cmpi eq, %arg0, %c1_i32_27 : i32
      %55 = arith.extui %54 : i1 to i32
      %c0_i32_28 = arith.constant 0 : i32
      %56 = arith.cmpi ne, %55, %c0_i32_28 : i32
      scf.if %56 {
        %60 = vector.broadcast %12 : vector<64x1xf32> to vector<64x64xf32>
        %61 = arith.mulf %53, %60 : vector<64x64xf32>
        %c0_30 = arith.constant 0 : index
        %c0_31 = arith.constant 0 : index
        %62 = vector.load %arg18[%c0_30, %c0_31] : memref<1x64xf32, #tpu.memory_space<vmem>>, vector<1x64xf32>
        %cst_32 = arith.constant dense<0.000000e+00> : vector<64xf32>
        %63 = vector.multi_reduction <add>, %61, %cst_32 [0] : vector<64x64xf32> to vector<64xf32>
        %64 = vector.shape_cast %63 : vector<64xf32> to vector<1x64xf32>
        %65 = arith.addf %62, %64 : vector<1x64xf32>
        %c0_33 = arith.constant 0 : index
        %c0_34 = arith.constant 0 : index
        %66 = vector.load %arg18[%c0_33, %c0_34] : memref<1x64xf32, #tpu.memory_space<vmem>>, vector<1x64xf32>
        tpu.vector_store %arg18[%c0_33, %c0_34], %65 {strides = array<i32>} : memref<1x64xf32, #tpu.memory_space<vmem>>, vector<1x64xf32>,
        %c0_35 = arith.constant 0 : index
        %c0_36 = arith.constant 0 : index
        %67 = vector.load %arg19[%c0_35, %c0_36] : memref<1x64xf32, #tpu.memory_space<vmem>>, vector<1x64xf32>
        %68 = arith.mulf %61, %61 : vector<64x64xf32>
        %cst_37 = arith.constant dense<0.000000e+00> : vector<64xf32>
        %69 = vector.multi_reduction <add>, %68, %cst_37 [0] : vector<64x64xf32> to vector<64xf32>
        %70 = vector.shape_cast %69 : vector<64xf32> to vector<1x64xf32>
        %71 = arith.addf %67, %70 : vector<1x64xf32>
        %c0_38 = arith.constant 0 : index
        %c0_39 = arith.constant 0 : index
        %72 = vector.load %arg19[%c0_38, %c0_39] : memref<1x64xf32, #tpu.memory_space<vmem>>, vector<1x64xf32>
        tpu.vector_store %arg19[%c0_38, %c0_39], %71 {strides = array<i32>} : memref<1x64xf32, #tpu.memory_space<vmem>>, vector<1x64xf32>,
      } else {
      }
      %c2_i32 = arith.constant 2 : i32
      %57 = arith.cmpi eq, %arg0, %c2_i32 : i32
      %58 = arith.extui %57 : i1 to i32
      %c0_i32_29 = arith.constant 0 : i32
      %59 = arith.cmpi ne, %58, %c0_i32_29 : i32
      scf.if %59 {
        %c0_30 = arith.constant 0 : index
        %c0_31 = arith.constant 0 : index
        %60 = vector.load %arg18[%c0_30, %c0_31] : memref<1x64xf32, #tpu.memory_space<vmem>>, vector<1x64xf32>
        %61 = vector.broadcast %cst_10 : f32 to vector<1x64xf32>
        %62 = arith.mulf %60, %61 : vector<1x64xf32>
        %c0_32 = arith.constant 0 : index
        %c0_33 = arith.constant 0 : index
        %63 = vector.load %arg19[%c0_32, %c0_33] : memref<1x64xf32, #tpu.memory_space<vmem>>, vector<1x64xf32>
        %64 = vector.broadcast %cst_10 : f32 to vector<1x64xf32>
        %65 = arith.mulf %63, %64 : vector<1x64xf32>
        %66 = arith.mulf %62, %62 : vector<1x64xf32>
        %67 = arith.subf %65, %66 : vector<1x64xf32>
        %cst_34 = arith.constant 9.99999974E-6 : f32
        %68 = vector.broadcast %cst_34 : f32 to vector<1x64xf32>
        %69 = arith.addf %67, %68 : vector<1x64xf32>
        %70 = math.rsqrt %69 : vector<1x64xf32>
        %c0_35 = arith.constant 0 : index
        %c0_36 = arith.constant 0 : index
        %71 = vector.load %arg9[%c0_35, %c0_36] : memref<1x64xf32, #tpu.memory_space<vmem>>, vector<1x64xf32>
        %72 = arith.mulf %70, %71 : vector<1x64xf32>
        %c0_37 = arith.constant 0 : index
        %c0_38 = arith.constant 0 : index
        %73 = vector.load %arg10[%c0_37, %c0_38] : memref<1x64xf32, #tpu.memory_space<vmem>>, vector<1x64xf32>
        %74 = arith.mulf %62, %72 : vector<1x64xf32>
        %75 = arith.subf %73, %74 : vector<1x64xf32>
        %76 = vector.broadcast %72 : vector<1x64xf32> to vector<64x64xf32>
        %77 = arith.mulf %53, %76 : vector<64x64xf32>
        %78 = vector.broadcast %75 : vector<1x64xf32> to vector<64x64xf32>
        %79 = arith.addf %77, %78 : vector<64x64xf32>
        %c0_39 = arith.constant 0 : index
        %c0_40 = arith.constant 0 : index
        %80 = vector.load %arg11[%c0_39, %c0_40] : memref<64x64xf32, #tpu.memory_space<vmem>>, vector<64x64xf32>
        %cst_41 = arith.constant dense<0.000000e+00> : vector<64x64xf32>
        %81 = tpu.matmul %79, %80, %cst_41 {dimension_numbers = #tpu.dot_dimension_numbers<[1], [0], [0], [1], [0, 0, 1, 1], [], []>} : vector<64x64xf32>, vector<64x64xf32>, vector<64x64xf32> -> vector<64x64xf32>
        %c0_42 = arith.constant 0 : index
        %c0_43 = arith.constant 0 : index
        %82 = vector.load %arg12[%c0_42, %c0_43] : memref<1x64xf32, #tpu.memory_space<vmem>>, vector<1x64xf32>
        %83 = vector.broadcast %82 : vector<1x64xf32> to vector<64x64xf32>
        %84 = arith.addf %81, %83 : vector<64x64xf32>
        %cst_44 = arith.constant 0.000000e+00 : f32
        %85 = vector.broadcast %cst_44 : f32 to vector<64x64xf32>
        %86 = arith.maximumf %84, %85 : vector<64x64xf32>
        %c0_45 = arith.constant 0 : index
        %c0_46 = arith.constant 0 : index
        %87 = vector.load %arg13[%c0_45, %c0_46] : memref<1x64xf32, #tpu.memory_space<vmem>>, vector<1x64xf32>
        %88 = vector.broadcast %87 : vector<1x64xf32> to vector<64x64xf32>
        %89 = arith.mulf %86, %88 : vector<64x64xf32>
        %cst_47 = arith.constant dense<0.000000e+00> : vector<64xf32>
        %90 = vector.multi_reduction <add>, %89, %cst_47 [1] : vector<64x64xf32> to vector<64xf32>
        %91 = vector.shape_cast %90 : vector<64xf32> to vector<64x1xf32>
        %c0_48 = arith.constant 0 : index
        %c0_49 = arith.constant 0 : index
        %92 = vector.load %arg14[%c0_48, %c0_49] : memref<1x1xf32, #tpu.memory_space<vmem>>, vector<1x1xf32>
        %93 = vector.broadcast %92 : vector<1x1xf32> to vector<64x1xf32>
        %94 = arith.addf %91, %93 : vector<64x1xf32>
        %c0_50 = arith.constant 0 : index
        %c0_51 = arith.constant 0 : index
        %95 = vector.load %arg15[%c0_50, %c0_51] : memref<64x1xf32, #tpu.memory_space<vmem>>, vector<64x1xf32>
        tpu.vector_store %arg15[%c0_50, %c0_51], %94 {strides = array<i32>} : memref<64x1xf32, #tpu.memory_space<vmem>>, vector<64x1xf32>,
      } else {
      }
    } else {
    }
    return
  }
  func.func @transform_0(%arg0: i32, %arg1: i32) -> (i32, i32) {
    %c0_i32 = arith.constant 0 : i32
    %c0_i32_0 = arith.constant 0 : i32
    return %arg1, %c0_i32 : i32, i32
  }
  func.func @transform_1(%arg0: i32, %arg1: i32) -> (i32, i32) {
    %c0_i32 = arith.constant 0 : i32
    %c0_i32_0 = arith.constant 0 : i32
    %c0_i32_1 = arith.constant 0 : i32
    return %c0_i32, %c0_i32_0 : i32, i32
  }
  func.func @transform_2(%arg0: i32, %arg1: i32) -> (i32, i32) {
    %c0_i32 = arith.constant 0 : i32
    %c0_i32_0 = arith.constant 0 : i32
    %c0_i32_1 = arith.constant 0 : i32
    return %c0_i32, %c0_i32_0 : i32, i32
  }
  func.func @transform_3(%arg0: i32, %arg1: i32) -> (i32, i32) {
    %c0_i32 = arith.constant 0 : i32
    %c0_i32_0 = arith.constant 0 : i32
    %c0_i32_1 = arith.constant 0 : i32
    return %c0_i32, %c0_i32_0 : i32, i32
  }
  func.func @transform_4(%arg0: i32, %arg1: i32) -> (i32, i32) {
    %c0_i32 = arith.constant 0 : i32
    %c0_i32_0 = arith.constant 0 : i32
    %c0_i32_1 = arith.constant 0 : i32
    return %c0_i32, %c0_i32_0 : i32, i32
  }
  func.func @transform_5(%arg0: i32, %arg1: i32) -> (i32, i32) {
    %c0_i32 = arith.constant 0 : i32
    %c0_i32_0 = arith.constant 0 : i32
    %c0_i32_1 = arith.constant 0 : i32
    return %c0_i32, %c0_i32_0 : i32, i32
  }
  func.func @transform_6(%arg0: i32, %arg1: i32) -> (i32, i32) {
    %c0_i32 = arith.constant 0 : i32
    %c0_i32_0 = arith.constant 0 : i32
    %c0_i32_1 = arith.constant 0 : i32
    return %c0_i32, %c0_i32_0 : i32, i32
  }
  func.func @transform_7(%arg0: i32, %arg1: i32) -> (i32, i32) {
    %c0_i32 = arith.constant 0 : i32
    %c0_i32_0 = arith.constant 0 : i32
    %c0_i32_1 = arith.constant 0 : i32
    return %c0_i32, %c0_i32_0 : i32, i32
  }
  func.func @transform_8(%arg0: i32, %arg1: i32) -> (i32, i32) {
    %c0_i32 = arith.constant 0 : i32
    %c0_i32_0 = arith.constant 0 : i32
    %c0_i32_1 = arith.constant 0 : i32
    return %c0_i32, %c0_i32_0 : i32, i32
  }
  func.func @transform_9(%arg0: i32, %arg1: i32) -> (i32, i32) {
    %c0_i32 = arith.constant 0 : i32
    %c0_i32_0 = arith.constant 0 : i32
    %c0_i32_1 = arith.constant 0 : i32
    return %c0_i32, %c0_i32_0 : i32, i32
  }
  func.func @transform_10(%arg0: i32, %arg1: i32) -> (i32, i32) {
    %c0_i32 = arith.constant 0 : i32
    %c0_i32_0 = arith.constant 0 : i32
    %c0_i32_1 = arith.constant 0 : i32
    return %c0_i32, %c0_i32_0 : i32, i32
  }
  func.func @transform_11(%arg0: i32, %arg1: i32) -> (i32, i32) {
    %c0_i32 = arith.constant 0 : i32
    %c0_i32_0 = arith.constant 0 : i32
    %c0_i32_1 = arith.constant 0 : i32
    return %c0_i32, %c0_i32_0 : i32, i32
  }
  func.func @transform_12(%arg0: i32, %arg1: i32) -> (i32, i32) {
    %c0_i32 = arith.constant 0 : i32
    %c0_i32_0 = arith.constant 0 : i32
    %c0_i32_1 = arith.constant 0 : i32
    return %c0_i32, %c0_i32_0 : i32, i32
  }
  func.func @transform_13(%arg0: i32, %arg1: i32) -> (i32, i32) {
    %c0_i32 = arith.constant 0 : i32
    %c0_i32_0 = arith.constant 0 : i32
    return %arg1, %c0_i32 : i32, i32
  }
}

</mosaic_0001>

<bundles_post_ra>
// kernel: tpu_custom_call.1
= control target key start
LH: loop header
LB: loop body
LE: loop exit
PB: predicated region body
PF: predicated region fallthrough
CT: control target
= control target key end

     0   :  { %s1753_s27 = smov 0   ;;  %s1755_s28 = smov 0   ;;  %s2165_s0 = inlined_call_operand.vmem [shape: f32[256,64], index: 0, kind: input, shape index: {}]   ;;  %s2166_s1 = inlined_call_operand.vmem [shape: f32[64,64], index: 1, kind: input, shape index: {}]   ;;  %s2167_s2 = inlined_call_operand.vmem [shape: f32[1,64], index: 2, kind: input, shape index: {}]   ;;  %s2168_s3 = inlined_call_operand.vmem [shape: f32[1,64], index: 3, kind: input, shape index: {}]   ;;  %s2169_s4 = inlined_call_operand.vmem [shape: f32[1,64], index: 4, kind: input, shape index: {}]   ;;  %s2170_s5 = inlined_call_operand.vmem [shape: f32[64,64], index: 5, kind: input, shape index: {}]   ;;  %s2171_s6 = inlined_call_operand.vmem [shape: f32[1,64], index: 6, kind: input, shape index: {}]   ;;  %s2172_s7 = inlined_call_operand.vmem [shape: f32[1,64], index: 7, kind: input, shape index: {}]   ;;  %s2173_s8 = inlined_call_operand.vmem [shape: f32[1,64], index: 8, kind: input, shape index: {}]   ;;  %s2174_s9 = inlined_call_operand.vmem [shape: f32[64,64], index: 9, kind: input, shape index: {}]   ;;  %s2175_s10 = inlined_call_operand.vmem [shape: f32[1,64], index: 10, kind: input, shape index: {}]   ;;  %s2176_s11 = inlined_call_operand.vmem [shape: f32[1,64], index: 11, kind: input, shape index: {}]   ;;  %s2177_s12 = inlined_call_operand.<no memory space> [shape: f32[1,1], index: 12, kind: input, shape index: {}]   ;;  %s2178_s13 = inlined_call_operand.vmem [shape: f32[256,1], index: 13, kind: output, shape index: {}]  }
   0x1   :  { %2179 = sst [smem:[#allocation7_spill]] %s2165_s0  ;;  %v18_v0 = vstv %s2177_s12  ;;  %s1757_s29 = smov 0  }
   0x2   :  { %19 = vst [vmem:[#allocation6] sm:$0x1] %v18_v0  ;;  %s1759_s30 = smov 0   ;;  %s1761_s14 = smov 0  }
   0x3 LB: > { %s34_s12 = sadd.s32 1, %s1668_s29  ;;  %s37_s15 = sadd.s32 1, %s1672_s30  ;;  %s1676_s14 = sphi %s1761_s14, %s25_s14   ;;  %s1672_s30 = sphi %s1759_s30, %s2184_s30   ;;  %s1668_s29 = sphi %s1757_s29, %s2183_s29   ;;  %s1664_s28 = sphi %s1755_s28, %s2182_s28   ;;  %s1660_s27 = sphi %s1753_s27, %s2181_s27  }
   0x4   : > { %p35_p0 = scmp.ge.s32.totalorder %s34_s12, 4  ;;  %p1339_p1 = scmp.ge.s32.totalorder %s1676_s14, 1 }
   0x5   : > { %p402_p2 = scmp.lt.s32.totalorder %s1676_s14, 13 }
   0x6   : > { %s2186_s12 = smov (%p35_p0, %s34_s12), 0  ;;  %s2188_s15 = smov (!%p35_p0, %s37_s15), %s1672_s30 }
   0x7   : > { %p403_p3 = pnand %p1339_p1, %p402_p2  ;;  %p39_p4 = scmp.ge.s32.totalorder %s2188_s15, 3 }
   0x8   : > { %s1340_s16 = sshll.u32 (!%p403_p3), %s1660_s27, 3  ;;  %p458_p5 = scmp.eq.s32.totalorder (!%p403_p3), %s1664_s28, 0 }
   0x9   : > { %s2190_s15 = smov (%p39_p4, %s2188_s15), 0  ;;  %406 = sbr.rel (%p403_p3) target bundleno = 994 (0x3e2), region = 72 }
   0xa   : > { %p447_p6 = scmp.lt.s32.totalorder (!%p403_p3), %s1340_s16, 31  ;;  %p459_p7 = scmp.eq.s32.totalorder (!%p403_p3), %s1660_s27, 0 }
   0xb   : > { %s2180_s0 = sld [smem:[#allocation7_spill]] (!%p403_p3) }
   0xc   : > { %p460_p8 = pnand (!%p403_p3), %p459_p7, %p458_p5 }
  0x10   : > { %s2192_s16 = smov (!%p447_p6, %s1340_s16), 31  ;;  %463 = sbr.rel (%p460_p8) target bundleno = 23 (0x17), region = 76 }
  0x11   : > { %s1341_s17 = sshll.u32 %s2192_s16, 3  ;;  %vm464_vm0 = vcmask (!%p460_p8), 516096   ;;  %v1678_v1 = vmov (!%p460_p8), 0.0  }
  0x12   : > { %s1793_s20 = scalar_lea.vmem %s2180_s0, %s1341_s17  ;;  %s1798_s23 = scalar_lea.vmem %s2178_s13, %s1341_s17  ;;  %465 = vst.msk [vmem:[#allocation2] sm:$0x1] (!%p460_p8), %vm464_vm0, %v1678_v1  ;;  %466 = vst.msk [vmem:[#allocation3] sm:$0x1] (!%p460_p8), %vm464_vm0, %v1678_v1 }
  0x13   : > { %467 = vst.msk [vmem:[#allocation4] sm:$0x1] (!%p460_p8), %vm464_vm0, %v1678_v1  ;;  %468 = vst.msk [vmem:[#allocation5] sm:$0x1] (!%p460_p8), %vm464_vm0, %v1678_v1 }
  0x17 PF: > { %s1344_s24 = sshll.u32 %s1660_s27, 6  ;;  %v470_v2 = vlaneseq  ;;  %v520_v3 = vld [vmem:[%s2166_s1] sm:$0xff]  ;;  %v521_v4 = vld [vmem:[%s2166_s1 + $0x8] sm:$0xff]  ;;  %v522_v5 = vld [vmem:[%s2166_s1 + $0x10] sm:$0xff]  ;;  %vm535_vm1 = vcmask 523264   ;;  %v1679_v34 = vmov 0.0  }
  0x18   : > { %v1520_v6 = vpack.c.bf16 %v521_v4, %v520_v3  ;;  %v523_v7 = vld [vmem:[%s2166_s1 + $0x18] sm:$0xff]  ;;  %v524_v8 = vld [vmem:[%s2166_s1 + $0x20] sm:$0xff]  ;;  %v525_v9 = vld [vmem:[%s2166_s1 + $0x28] sm:$0xff]  ;;  %v479_v11 = vstv %s1344_s24  ;;  %p1362_p9 = scmp.ne.s32.totalorder %s1664_s28, 0 }
  0x19   : > { %v1819_v10 = vshrl.u32 %v470_v2, 7  ;;  %v1524_v12 = vpack.c.bf16 %v523_v7, %v522_v5  ;;  %v526_v13 = vld [vmem:[%s2166_s1 + $0x30] sm:$0xff]  ;;  %v527_v14 = vld [vmem:[%s2166_s1 + $0x38] sm:$0xff]  ;;  %v1528_v15 = vpack.c.bf16 %v525_v9, %v524_v8  ;;  %v512_v17 = vld [vmem:[%s1793_s20] sm:$0xff]  ;;  %vm707_vm10 = vcmask (!%p1362_p9), 516096  }
  0x1a   : > { %1521 = vmatprep.subr.bf16.mxu0 %v1520_v6  ;;  %1568 = vmatprep.subr.bf16.mxu1 %v1520_v6  ;;  %v1532_v16 = vpack.c.bf16 %v527_v14, %v526_v13  ;;  %v516_v22 = vld [vmem:[%s1793_s20 + $0x20] sm:$0xff]  ;;  %v513_v43 = vld [vmem:[%s1793_s20 + $0x8] sm:$0xff]  ;;  %v514_v45 = vld [vmem:[%s1793_s20 + $0x10] sm:$0xff] }
  0x1b   : > { %v472_v18 = vadd.s32 8, %v1819_v10  ;;  %v473_v19 = vadd.s32 16, %v1819_v10  ;;  %v474_v20 = vadd.s32 24, %v1819_v10  ;;  %v475_v21 = vadd.s32 32, %v1819_v10  ;;  %1523 = vmatpush3.bf16.msra.mxu0 %v1520_v6  ;;  %1572 = vmatpush3.bf16.msra.mxu1 %v1520_v6  ;;  %v517_v44 = vld [vmem:[%s1793_s20 + $0x28] sm:$0xff]  ;;  %v518_v46 = vld [vmem:[%s1793_s20 + $0x30] sm:$0xff] }
  0x1c   : > { %v476_v23 = vadd.s32 40, %v1819_v10  ;;  %v477_v24 = vadd.s32 48, %v1819_v10  ;;  %v478_v25 = vadd.s32 56, %v1819_v10  ;;  %v480_v26 = vadd.s32 %v479_v11, %v1819_v10  ;;  %1525 = vmatprep.subr.bf16.mxu0 %v1524_v12  ;;  %1569 = vmatprep.subr.bf16.mxu1 %v1524_v12  ;;  %v515_v47 = vld [vmem:[%s1793_s20 + $0x18] sm:$0xff]  ;;  %v1353_v49 = vld [vmem:[%s2167_s2] ss:$0 sm:$0xff] }
  0x1d   : > { %v481_v27 = vadd.s32 %v479_v11, %v472_v18  ;;  %v482_v28 = vadd.s32 %v479_v11, %v473_v19  ;;  %v483_v29 = vadd.s32 %v479_v11, %v474_v20  ;;  %v484_v30 = vadd.s32 %v479_v11, %v475_v21  ;;  %1452 = vmatprep.mubr.msk.f32.mxu0 %vm535_vm1, %v512_v17  ;;  %v519_v48 = vld [vmem:[%s1793_s20 + $0x38] sm:$0xff] }
  0x1e   : > { %v485_v31 = vadd.s32 %v479_v11, %v476_v23  ;;  %v486_v32 = vadd.s32 %v479_v11, %v477_v24  ;;  %v487_v33 = vadd.s32 %v479_v11, %v478_v25  ;;  %vm488_vm2 = vcmp.lt.s32.totalorder %v480_v26, 200  ;;  %1458 = vmatprep.mubr.msk.f32.mxu1 %vm535_vm1, %v516_v22 }
  0x1f   : > { %vm489_vm3 = vcmp.lt.s32.totalorder %v481_v27, 200  ;;  %vm490_vm4 = vcmp.lt.s32.totalorder %v482_v28, 200  ;;  %vm491_vm5 = vcmp.lt.s32.totalorder %v483_v29, 200  ;;  %vm492_vm6 = vcmp.lt.s32.totalorder %v484_v30, 200  ;;  %1527 = vmatpush3.bf16.msra.mxu0 %v1524_v12  ;;  %1573 = vmatpush3.bf16.msra.mxu1 %v1524_v12 }
  0x20   : > { %vm493_vm7 = vcmp.lt.s32.totalorder %v485_v31, 200  ;;  %vm494_vm8 = vcmp.lt.s32.totalorder %v486_v32, 200  ;;  %vm495_vm9 = vcmp.lt.s32.totalorder %v487_v33, 200  ;;  %v1839_v35 = vsel %vm488_vm2, 1.0, %v1679_v34  ;;  %1529 = vmatprep.subr.bf16.mxu0 %v1528_v15  ;;  %1570 = vmatprep.subr.bf16.mxu1 %v1528_v15 }
  0x21   : > { %v1841_v36 = vsel %vm489_vm3, 1.0, %v1679_v34  ;;  %v1843_v37 = vsel %vm490_vm4, 1.0, %v1679_v34  ;;  %v1845_v38 = vsel %vm491_vm5, 1.0, %v1679_v34  ;;  %v1847_v39 = vsel %vm492_vm6, 1.0, %v1679_v34 }
  0x22   : > { %v1849_v40 = vsel %vm493_vm7, 1.0, %v1679_v34  ;;  %v1851_v41 = vsel %vm494_vm8, 1.0, %v1679_v34  ;;  %v1853_v42 = vsel %vm495_vm9, 1.0, %v1679_v34 }
  0x23   : > { %1531 = vmatpush3.bf16.msra.mxu0 %v1528_v15  ;;  %1574 = vmatpush3.bf16.msra.mxu1 %v1528_v15 }
  0x24   : > { %1533 = vmatprep.subr.bf16.mxu0 %v1532_v16  ;;  %1571 = vmatprep.subr.bf16.mxu1 %v1532_v16 }
  0x27   : > { %1535 = vmatpush3.bf16.msra.mxu0 %v1532_v16  ;;  %1575 = vmatpush3.bf16.msra.mxu1 %v1532_v16 }
  0x2a   : > { %1453 = vmatmul.mubr.msk.f32.vlgmr.msra.gmra.mrb[0].mxu0 %vm535_vm1, %v513_v43  ;;  %1459 = vmatmul.mubr.msk.f32.vlgmr.msra.gmra.mrb[0].mxu1 %vm535_vm1, %v517_v44 }
  0x2b   : > { %1455 = vmatprep.mubr.msk.f32.mxu0 %vm535_vm1, %v514_v45  ;;  %1461 = vmatprep.mubr.msk.f32.mxu1 %vm535_vm1, %v518_v46 }
  0x2e   : > { %1456 = vmatmul.mubr.msk.f32.gmra.mrb[2].mxu0 %vm535_vm1, %v515_v47  ;;  %1462 = vmatmul.mubr.msk.f32.gmra.mrb[2].mxu1 %vm535_vm1, %v519_v48 }
  0xfd   : > { %v1454_v50 = vpop.f32.mrb[0].mxu0  ;;  %v1460_v51 = vpop.f32.mrb[0].mxu1 }
  0xfe   : > { %v1870_v52 = vadd.f32 %v1454_v50, %v1353_v49  ;;  %v1872_v53 = vadd.f32 %v1460_v51, %v1353_v49  ;;  %v626_v54 = vpop.f32.mrb[1].mxu0  ;;  %v646_v55 = vpop.f32.mrb[1].mxu1 }
  0xff   : > { %v1874_v56 = vadd.f32 %v1353_v49, %v626_v54  ;;  %v1876_v57 = vadd.f32 %v1353_v49, %v646_v55  ;;  %675 = sbr.rel (%p1362_p9) target bundleno = 295 (0x127), region = 80 }
 0x100   : > { %v666_v58 = vmax.f32 %v1870_v52, 0.0  ;;  %v670_v59 = vmax.f32 %v1872_v53, 0.0 }
 0x101   : > { %v665_v60 = vmax.f32 %v1874_v56, 0.0  ;;  %v669_v61 = vmax.f32 %v1876_v57, 0.0  ;;  %v1457_v62 = vpop.f32.mrb[2].mxu0  ;;  %v1463_v63 = vpop.f32.mrb[2].mxu1 }
 0x102   : > { %v1882_v0 = vadd.f32 %v1457_v62, %v1353_v49  ;;  %v1884_v1 = vadd.f32 %v1463_v63, %v1353_v49  ;;  %v636_v2 = vpop.f32.mrb[3].mxu0  ;;  %v656_v3 = vpop.f32.mrb[3].mxu1  ;;  %v677_v12 = vmul.f32 (!%p1362_p9), %v1841_v36, %v666_v58  ;;  %v681_v23 = vmul.f32 (!%p1362_p9), %v1849_v40, %v670_v59 }
 0x103   : > { %v1886_v4 = vadd.f32 %v1353_v49, %v636_v2  ;;  %v1888_v5 = vadd.f32 %v1353_v49, %v656_v3  ;;  %v676_v11 = vmul.f32 (!%p1362_p9), %v1839_v35, %v665_v60  ;;  %v680_v18 = vmul.f32 (!%p1362_p9), %v1847_v39, %v669_v61 }
 0x104   : > { %v668_v6 = vmax.f32 %v1882_v0, 0.0  ;;  %v672_v7 = vmax.f32 %v1884_v1, 0.0  ;;  %v686_v16 = vsel (!%p1362_p9), %vm535_vm1, %v677_v12, 0.0  ;;  %v711_v22 = vmul.f32 (!%p1362_p9), %v677_v12, %v677_v12 }
 0x105   : > { %v667_v8 = vmax.f32 %v1886_v4, 0.0  ;;  %v671_v9 = vmax.f32 %v1888_v5, 0.0  ;;  %v685_v15 = vsel (!%p1362_p9), %vm535_vm1, %v676_v11, 0.0  ;;  %v710_v21 = vmul.f32 (!%p1362_p9), %v676_v11, %v676_v11 }
 0x106   : > { %v679_v14 = vmul.f32 %v1845_v38, %v668_v6  ;;  %v687_v19 = vadd.f32 %v686_v16, %v685_v15  ;;  %v692_v28 = vsel %vm535_vm1, %v680_v18, 0.0  ;;  %v714_v31 = vmul.f32 %v680_v18, %v680_v18 }
 0x107   : > { %v678_v13 = vmul.f32 %v1843_v37, %v667_v8  ;;  %v682_v27 = vmul.f32 %v1851_v41, %v671_v9  ;;  %v718_v29 = vsel %vm535_vm1, %v710_v21, 0.0  ;;  %v719_v32 = vsel %vm535_vm1, %v711_v22, 0.0 }
 0x108   : > { %v690_v20 = vsel %vm535_vm1, %v679_v14, 0.0  ;;  %v713_v26 = vmul.f32 %v679_v14, %v679_v14  ;;  %v694_v34 = vsel %vm535_vm1, %v681_v23, 0.0  ;;  %v720_v43 = vadd.f32 %v719_v32, %v718_v29 }
 0x109   : > { %v688_v17 = vsel %vm535_vm1, %v678_v13, 0.0  ;;  %v712_v25 = vmul.f32 %v678_v13, %v678_v13  ;;  %v683_v44 = vmul.f32 %v1853_v42, %v672_v7  ;;  %v715_v46 = vmul.f32 %v681_v23, %v681_v23 }
 0x10a   : > { %v689_v24 = vadd.f32 %v688_v17, %v687_v19  ;;  %v723_v47 = vsel %vm535_vm1, %v713_v26, 0.0  ;;  %v696_v48 = vsel %vm535_vm1, %v682_v27, 0.0  ;;  %v716_v51 = vmul.f32 %v682_v27, %v682_v27 }
 0x10b   : > { %v721_v33 = vsel %vm535_vm1, %v712_v25, 0.0  ;;  %v725_v54 = vsel %vm535_vm1, %v714_v31, 0.0  ;;  %v698_v55 = vsel %vm535_vm1, %v683_v44, 0.0  ;;  %v717_v2 = vmul.f32 %v683_v44, %v683_v44  ;;  %v684_v25 = vld [vmem:[#allocation2] sm:$0x1] }
 0x10c   : > { %v691_v30 = vadd.f32 %v690_v20, %v689_v24  ;;  %v722_v49 = vadd.f32 %v721_v33, %v720_v43  ;;  %v727_v3 = vsel %vm535_vm1, %v715_v46, 0.0  ;;  %v729_v13 = vsel %vm535_vm1, %v716_v51, 0.0  ;;  %v709_v31 = vld [vmem:[#allocation3] sm:$0x1] }
 0x10d   : > { %v731_v16 = vsel %vm535_vm1, %v717_v2, 0.0 }
 0x10e   : > { %v693_v45 = vadd.f32 %v692_v28, %v691_v30  ;;  %v724_v62 = vadd.f32 %v723_v47, %v722_v49 }
 0x110   : > { %v695_v50 = vadd.f32 %v694_v34, %v693_v45  ;;  %v726_v11 = vadd.f32 %v725_v54, %v724_v62 }
 0x112   : > { %v697_v63 = vadd.f32 %v696_v48, %v695_v50  ;;  %v728_v14 = vadd.f32 %v727_v3, %v726_v11 }
 0x114   : > { %v699_v12 = vadd.f32 %v698_v55, %v697_v63  ;;  %v730_v17 = vadd.f32 %v729_v13, %v728_v14 }
 0x116   : > { %v700_v15 = vrot.slane %v699_v12, 4  ;;  %v732_v19 = vadd.f32 %v731_v16, %v730_v17 }
 0x118   : > { %v701_v18 = vadd.f32 %v700_v15, %v699_v12  ;;  %v733_v21 = vrot.slane %v732_v19, 4 }
 0x11a   : > { %v702_v20 = vrot.slane %v701_v18, 2  ;;  %v734_v23 = vadd.f32 %v733_v21, %v732_v19 }
 0x11c   : > { %v703_v22 = vadd.f32 %v702_v20, %v701_v18  ;;  %v735_v26 = vrot.slane %v734_v23, 2 }
 0x11e   : > { %v704_v24 = vrot.slane %v703_v22, 1  ;;  %v736_v28 = vadd.f32 %v735_v26, %v734_v23 }
 0x120   : > { %v705_v27 = vadd.f32 %v704_v24, %v703_v22  ;;  %v737_v30 = vrot.slane %v736_v28, 1 }
 0x122   : > { %v706_v29 = vadd.f32 %v705_v27, %v684_v25  ;;  %v738_v32 = vadd.f32 %v737_v30, %v736_v28 }
 0x124   : > { %708 = vst.msk [vmem:[#allocation2] sm:$0x1] %vm707_vm10, %v706_v29  ;;  %v739_v33 = vadd.f32 %v738_v32, %v709_v31 }
 0x126   : > { %740 = vst.msk [vmem:[#allocation3] sm:$0x1] %vm707_vm10, %v739_v33 }
 0x127 PF: > { %p1363_p10 = scmp.lt.s32.totalorder %s1664_s28, 1 }
 0x128   : > { %v786_v34 = vld [vmem:[%s2170_s5] sm:$0xff] (!%p1363_p10)  ;;  %v787_v43 = vld [vmem:[%s2170_s5 + $0x8] sm:$0xff] (!%p1363_p10)  ;;  %v788_v44 = vld [vmem:[%s2170_s5 + $0x10] sm:$0xff] (!%p1363_p10)  ;;  %v1964_v15 = vsub.s32 (!%p1363_p10), 0, %v1819_v10  ;;  %p1373_p11 = scmp.ne.s32.totalorder (!%p1363_p10), %s1664_s28, 1 }
 0x129   : > { %744 = sbr.rel (%p1363_p10) target bundleno = 994 (0x3e2), region = 84  ;;  %v1536_v45 = vpack.c.bf16 (!%p1363_p10), %v787_v43, %v786_v34  ;;  %v789_v46 = vld [vmem:[%s2170_s5 + $0x18] sm:$0xff] (!%p1363_p10)  ;;  %v790_v48 = vld [vmem:[%s2170_s5 + $0x20] sm:$0xff] (!%p1363_p10)  ;;  %v791_v49 = vld [vmem:[%s2170_s5 + $0x28] sm:$0xff] (!%p1363_p10) }
 0x12a   : > { %v1540_v47 = vpack.c.bf16 (!%p1363_p10), %v789_v46, %v788_v44  ;;  %v1544_v62 = vpack.c.bf16 (!%p1363_p10), %v791_v49, %v790_v48  ;;  %v792_v2 = vld [vmem:[%s2170_s5 + $0x30] sm:$0xff] (!%p1363_p10)  ;;  %v793_v3 = vld [vmem:[%s2170_s5 + $0x38] sm:$0xff] (!%p1363_p10)  ;;  %v753_v14 = vld [vmem:[%s2168_s3] sm:$0x1] (!%p1363_p10) }
 0x12b   : > { %v745_v50 = vld [vmem:[#allocation2] sm:$0x1] (!%p1363_p10)  ;;  %1537 = vmatprep.subr.bf16.mxu0 (!%p1363_p10), %v1536_v45  ;;  %1576 = vmatprep.subr.bf16.mxu1 (!%p1363_p10), %v1536_v45  ;;  %v1548_v12 = vpack.c.bf16 (!%p1363_p10), %v793_v3, %v792_v2 }
 0x12c   : > { %v746_v51 = vmul.f32 (!%p1363_p10), 0.005, %v745_v50  ;;  %1539 = vmatpush3.bf16.msra.mxu0 (!%p1363_p10), %v1536_v45  ;;  %1580 = vmatpush3.bf16.msra.mxu1 (!%p1363_p10), %v1536_v45  ;;  %v755_v18 = vld [vmem:[%s2169_s4] sm:$0x1] (!%p1363_p10) }
 0x12d   : > { %v747_v54 = vld [vmem:[#allocation3] sm:$0x1] (!%p1363_p10)  ;;  %1541 = vmatprep.subr.bf16.mxu0 (!%p1363_p10), %v1540_v47  ;;  %1577 = vmatprep.subr.bf16.mxu1 (!%p1363_p10), %v1540_v47  ;;  %v1364_v1 = vld [vmem:[%s2171_s6] ss:$0 sm:$0xff] (!%p1363_p10) }
 0x12e   : > { %v748_v55 = vmul.f32 (!%p1363_p10), 0.005, %v747_v54  ;;  %v749_v63 = vmul.f32 (!%p1363_p10), %v746_v51, %v746_v51 }
 0x130   : > { %v750_v11 = vsub.f32 %v748_v55, %v749_v63  ;;  %1543 = vmatpush3.bf16.msra.mxu0 %v1540_v47  ;;  %1581 = vmatpush3.bf16.msra.mxu1 %v1540_v47  ;;  %vm973_vm11 = vcmask (!%p1373_p11), 516096  }
 0x131   : > { %1545 = vmatprep.subr.bf16.mxu0 %v1544_v62  ;;  %1578 = vmatprep.subr.bf16.mxu1 %v1544_v62 }
 0x132   : > { %v751_v13 = vadd.f32 1e-05, %v750_v11 }
 0x134   : > { %1634 = vrsqrt.f32 %v751_v13  ;;  %1547 = vmatpush3.bf16.msra.mxu0 %v1544_v62  ;;  %1582 = vmatpush3.bf16.msra.mxu1 %v1544_v62 }
 0x135   : > { %1549 = vmatprep.subr.bf16.mxu0 %v1548_v12  ;;  %1579 = vmatprep.subr.bf16.mxu1 %v1548_v12 }
 0x138   : > { %1551 = vmatpush3.bf16.msra.mxu0 %v1548_v12  ;;  %1583 = vmatpush3.bf16.msra.mxu1 %v1548_v12 }
 0x13e   : > { %v1635_v16 = vpop.eup %1634 }
 0x13f   : > { %v754_v17 = vmul.f32 %v1635_v16, %v753_v14 }
 0x141   : > { %v756_v19 = vmul.f32 %v754_v17, %v746_v51  ;;  %v762_v20 = vrot.slane %v754_v17, %v1964_v15 }
 0x143   : > { %v757_v21 = vsub.f32 %v755_v18, %v756_v19  ;;  %v764_v22 = vmul.f32 %v762_v20, %v665_v60  ;;  %v768_v23 = vmul.f32 %v762_v20, %v669_v61  ;;  %v765_v10 = vmul.f32 %v762_v20, %v666_v58 }
 0x144   : > { %v769_v24 = vmul.f32 %v762_v20, %v670_v59  ;;  %v766_v25 = vmul.f32 %v762_v20, %v667_v8  ;;  %v770_v26 = vmul.f32 %v762_v20, %v671_v9  ;;  %v767_v56 = vmul.f32 %v762_v20, %v668_v6 }
 0x145   : > { %v776_v27 = vrot.slane %v757_v21, %v1964_v15  ;;  %v771_v57 = vmul.f32 %v762_v20, %v672_v7 }
 0x147   : > { %v778_v60 = vadd.f32 %v776_v27, %v764_v22  ;;  %v782_v52 = vadd.f32 %v776_v27, %v768_v23  ;;  %v779_v58 = vadd.f32 %v776_v27, %v765_v10  ;;  %v783_v61 = vadd.f32 %v776_v27, %v769_v24 }
 0x148   : > { %v780_v53 = vadd.f32 %v776_v27, %v766_v25  ;;  %v784_v59 = vadd.f32 %v776_v27, %v770_v26  ;;  %v781_v4 = vadd.f32 %v776_v27, %v767_v56  ;;  %v785_v0 = vadd.f32 %v776_v27, %v771_v57 }
 0x149   : > { %1480 = vmatprep.mubr.msk.f32.mxu0 %vm535_vm1, %v778_v60  ;;  %1486 = vmatprep.mubr.msk.f32.mxu1 %vm535_vm1, %v782_v52 }
 0x14a   : > { %1481 = vmatmul.mubr.msk.f32.vlgmr.msra.gmra.mrb[0].mxu0 %vm535_vm1, %v779_v58  ;;  %1487 = vmatmul.mubr.msk.f32.vlgmr.msra.gmra.mrb[0].mxu1 %vm535_vm1, %v783_v61 }
 0x14b   : > { %1483 = vmatprep.mubr.msk.f32.mxu0 %vm535_vm1, %v780_v53  ;;  %1489 = vmatprep.mubr.msk.f32.mxu1 %vm535_vm1, %v784_v59 }
 0x14e   : > { %1484 = vmatmul.mubr.msk.f32.gmra.mrb[2].mxu0 %vm535_vm1, %v781_v4  ;;  %1490 = vmatmul.mubr.msk.f32.gmra.mrb[2].mxu1 %vm535_vm1, %v785_v0 }
 0x21d   : > { %v1482_v5 = vpop.f32.mrb[0].mxu0  ;;  %v1488_v6 = vpop.f32.mrb[0].mxu1 }
 0x21e   : > { %v1998_v7 = vadd.f32 %v1482_v5, %v1364_v1  ;;  %v2000_v8 = vadd.f32 %v1488_v6, %v1364_v1  ;;  %v891_v9 = vpop.f32.mrb[1].mxu0  ;;  %v911_v28 = vpop.f32.mrb[1].mxu1 }
 0x21f   : > { %v2002_v29 = vadd.f32 %v1364_v1, %v891_v9  ;;  %v2004_v30 = vadd.f32 %v1364_v1, %v911_v28  ;;  %941 = sbr.rel (%p1373_p11) target bundleno = 583 (0x247), region = 88 }
 0x220   : > { %v931_v31 = vmax.f32 %v1998_v7, 0.0  ;;  %v935_v32 = vmax.f32 %v2000_v8, 0.0 }
 0x221   : > { %v930_v33 = vmax.f32 %v2002_v29, 0.0  ;;  %v934_v34 = vmax.f32 %v2004_v30, 0.0  ;;  %v1485_v43 = vpop.f32.mrb[2].mxu0  ;;  %v1491_v44 = vpop.f32.mrb[2].mxu1 }
 0x222   : > { %v2010_v45 = vadd.f32 %v1485_v43, %v1364_v1  ;;  %v2012_v46 = vadd.f32 %v1491_v44, %v1364_v1  ;;  %v901_v47 = vpop.f32.mrb[3].mxu0  ;;  %v921_v48 = vpop.f32.mrb[3].mxu1  ;;  %v943_v2 = vmul.f32 (!%p1373_p11), %v1841_v36, %v931_v31 }
 0x223   : > { %v2014_v49 = vadd.f32 %v1364_v1, %v901_v47  ;;  %v2016_v50 = vadd.f32 %v1364_v1, %v921_v48  ;;  %v942_v63 = vmul.f32 (!%p1373_p11), %v1839_v35, %v930_v33  ;;  %v946_v35 = vmul.f32 (!%p1373_p11), %v1847_v39, %v934_v34 }
 0x224   : > { %v933_v51 = vmax.f32 %v2010_v45, 0.0  ;;  %v937_v54 = vmax.f32 %v2012_v46, 0.0  ;;  %v952_v13 = vsel (!%p1373_p11), %vm535_vm1, %v943_v2, 0.0  ;;  %v977_v18 = vmul.f32 (!%p1373_p11), %v943_v2, %v943_v2 }
 0x225   : > { %v932_v55 = vmax.f32 %v2014_v49, 0.0  ;;  %v936_v62 = vmax.f32 %v2016_v50, 0.0  ;;  %v951_v12 = vsel (!%p1373_p11), %vm535_vm1, %v942_v63, 0.0  ;;  %v976_v17 = vmul.f32 (!%p1373_p11), %v942_v63, %v942_v63 }
 0x226   : > { %v945_v11 = vmul.f32 %v1845_v38, %v933_v51  ;;  %v953_v16 = vadd.f32 %v952_v13, %v951_v12  ;;  %v958_v22 = vsel %vm535_vm1, %v946_v35, 0.0  ;;  %v980_v10 = vmul.f32 %v946_v35, %v946_v35 }
 0x227   : > { %v944_v3 = vmul.f32 %v1843_v37, %v932_v55  ;;  %v947_v37 = vmul.f32 %v1849_v40, %v935_v32  ;;  %v948_v21 = vmul.f32 %v1851_v41, %v936_v62  ;;  %v984_v39 = vsel %vm535_vm1, %v976_v17, 0.0 }
 0x228   : > { %v956_v36 = vsel %vm535_vm1, %v945_v11, 0.0  ;;  %v979_v20 = vmul.f32 %v945_v11, %v945_v11  ;;  %v985_v24 = vsel %vm535_vm1, %v977_v18, 0.0  ;;  %v949_v27 = vmul.f32 %v1853_v42, %v937_v54 }
 0x229   : > { %v954_v14 = vsel %vm535_vm1, %v944_v3, 0.0  ;;  %v978_v19 = vmul.f32 %v944_v3, %v944_v3  ;;  %v960_v26 = vsel %vm535_vm1, %v947_v37, 0.0  ;;  %v986_v40 = vadd.f32 %v985_v24, %v984_v39 }
 0x22a   : > { %v955_v38 = vadd.f32 %v954_v14, %v953_v16  ;;  %v981_v57 = vmul.f32 %v947_v37, %v947_v37  ;;  %v989_v41 = vsel %vm535_vm1, %v979_v20, 0.0  ;;  %v962_v60 = vsel %vm535_vm1, %v948_v21, 0.0  ;;  %v950_v14 = vld [vmem:[#allocation4] sm:$0x1]  ;;  %v975_v37 = vld [vmem:[#allocation5] sm:$0x1] }
 0x22b   : > { %v987_v25 = vsel %vm535_vm1, %v978_v19, 0.0  ;;  %v982_v61 = vmul.f32 %v948_v21, %v948_v21  ;;  %v991_v53 = vsel %vm535_vm1, %v980_v10, 0.0  ;;  %v964_v59 = vsel %vm535_vm1, %v949_v27, 0.0 }
 0x22c   : > { %v957_v23 = vadd.f32 %v956_v36, %v955_v38  ;;  %v988_v52 = vadd.f32 %v987_v25, %v986_v40  ;;  %v983_v1 = vmul.f32 %v949_v27, %v949_v27  ;;  %v993_v5 = vsel %vm535_vm1, %v981_v57, 0.0 }
 0x22d   : > { %v995_v9 = vsel %vm535_vm1, %v982_v61, 0.0 }
 0x22e   : > { %v959_v56 = vadd.f32 %v958_v22, %v957_v23  ;;  %v990_v4 = vadd.f32 %v989_v41, %v988_v52  ;;  %v997_v44 = vsel %vm535_vm1, %v983_v1, 0.0 }
 0x230   : > { %v961_v58 = vadd.f32 %v960_v26, %v959_v56  ;;  %v992_v6 = vadd.f32 %v991_v53, %v990_v4 }
 0x232   : > { %v963_v0 = vadd.f32 %v962_v60, %v961_v58  ;;  %v994_v28 = vadd.f32 %v993_v5, %v992_v6 }
 0x234   : > { %v965_v42 = vadd.f32 %v964_v59, %v963_v0  ;;  %v996_v47 = vadd.f32 %v995_v9, %v994_v28 }
 0x236   : > { %v966_v43 = vrot.slane %v965_v42, 4  ;;  %v998_v63 = vadd.f32 %v997_v44, %v996_v47 }
 0x238   : > { %v967_v48 = vadd.f32 %v966_v43, %v965_v42  ;;  %v999_v3 = vrot.slane %v998_v63, 4 }
 0x23a   : > { %v968_v2 = vrot.slane %v967_v48, 2  ;;  %v1000_v12 = vadd.f32 %v999_v3, %v998_v63 }
 0x23c   : > { %v969_v11 = vadd.f32 %v968_v2, %v967_v48  ;;  %v1001_v35 = vrot.slane %v1000_v12, 2 }
 0x23e   : > { %v970_v13 = vrot.slane %v969_v11, 1  ;;  %v1002_v36 = vadd.f32 %v1001_v35, %v1000_v12 }
 0x240   : > { %v971_v16 = vadd.f32 %v970_v13, %v969_v11  ;;  %v1003_v18 = vrot.slane %v1002_v36, 1 }
 0x242   : > { %v972_v17 = vadd.f32 %v971_v16, %v950_v14  ;;  %v1004_v38 = vadd.f32 %v1003_v18, %v1002_v36 }
 0x244   : > { %974 = vst.msk [vmem:[#allocation4] sm:$0x1] %vm973_vm11, %v972_v17  ;;  %v1005_v19 = vadd.f32 %v1004_v38, %v975_v37 }
 0x246   : > { %1006 = vst.msk [vmem:[#allocation5] sm:$0x1] %vm973_vm11, %v1005_v19 }
 0x247 PF: > { %p1374_p12 = scmp.ne.s32.totalorder %s1664_s28, 2 }
 0x248   : > { %v1052_v20 = vld [vmem:[%s2174_s9] sm:$0xff] (!%p1374_p12)  ;;  %v1053_v21 = vld [vmem:[%s2174_s9 + $0x8] sm:$0xff] (!%p1374_p12)  ;;  %v1054_v22 = vld [vmem:[%s2174_s9 + $0x10] sm:$0xff] (!%p1374_p12)  ;;  %vm1258_vm12 = vcmask (!%p1374_p12), 7168  }
 0x249   : > { %1010 = sbr.rel (%p1374_p12) target bundleno = 994 (0x3e2), region = 92  ;;  %v1552_v39 = vpack.c.bf16 (!%p1374_p12), %v1053_v21, %v1052_v20  ;;  %v1055_v23 = vld [vmem:[%s2174_s9 + $0x18] sm:$0xff] (!%p1374_p12)  ;;  %v1056_v24 = vld [vmem:[%s2174_s9 + $0x20] sm:$0xff] (!%p1374_p12)  ;;  %v1057_v25 = vld [vmem:[%s2174_s9 + $0x28] sm:$0xff] (!%p1374_p12) }
 0x24a   : > { %v1556_v10 = vpack.c.bf16 (!%p1374_p12), %v1055_v23, %v1054_v22  ;;  %v1560_v57 = vpack.c.bf16 (!%p1374_p12), %v1057_v25, %v1056_v24  ;;  %v1058_v60 = vld [vmem:[%s2174_s9 + $0x30] sm:$0xff] (!%p1374_p12)  ;;  %v1059_v52 = vld [vmem:[%s2174_s9 + $0x38] sm:$0xff] (!%p1374_p12)  ;;  %v1019_v59 = vld [vmem:[%s2172_s7] sm:$0x1] (!%p1374_p12) }
 0x24b   : > { %v1011_v26 = vld [vmem:[#allocation4] sm:$0x1] (!%p1374_p12)  ;;  %1553 = vmatprep.subr.bf16.mxu0 (!%p1374_p12), %v1552_v39  ;;  %1584 = vmatprep.subr.bf16.mxu1 (!%p1374_p12), %v1552_v39  ;;  %v1564_v61 = vpack.c.bf16 (!%p1374_p12), %v1059_v52, %v1058_v60  ;;  %v1021_v1 = vld [vmem:[%s2173_s8] sm:$0x1] (!%p1374_p12) }
 0x24c   : > { %v1012_v40 = vmul.f32 (!%p1374_p12), 0.005, %v1011_v26  ;;  %1555 = vmatpush3.bf16.msra.mxu0 (!%p1374_p12), %v1552_v39  ;;  %1588 = vmatpush3.bf16.msra.mxu1 (!%p1374_p12), %v1552_v39  ;;  %v1375_v46 = vld [vmem:[%s2175_s10] ss:$0 sm:$0xff] (!%p1374_p12) }
 0x24d   : > { %v1013_v27 = vld [vmem:[#allocation5] sm:$0x1] (!%p1374_p12)  ;;  %1557 = vmatprep.subr.bf16.mxu0 (!%p1374_p12), %v1556_v10  ;;  %1585 = vmatprep.subr.bf16.mxu1 (!%p1374_p12), %v1556_v10  ;;  %v1384_v11 = vld [vmem:[%s2176_s11] ss:$0 sm:$0xff] (!%p1374_p12) }
 0x24e   : > { %v1014_v56 = vmul.f32 (!%p1374_p12), 0.005, %v1013_v27  ;;  %v1015_v41 = vmul.f32 (!%p1374_p12), %v1012_v40, %v1012_v40 }
 0x250   : > { %v1016_v58 = vsub.f32 %v1014_v56, %v1015_v41  ;;  %1559 = vmatpush3.bf16.msra.mxu0 %v1556_v10  ;;  %1589 = vmatpush3.bf16.msra.mxu1 %v1556_v10 }
 0x251   : > { %1561 = vmatprep.subr.bf16.mxu0 %v1560_v57  ;;  %1586 = vmatprep.subr.bf16.mxu1 %v1560_v57 }
 0x252   : > { %v1017_v53 = vadd.f32 1e-05, %v1016_v58 }
 0x254   : > { %1636 = vrsqrt.f32 %v1017_v53  ;;  %1563 = vmatpush3.bf16.msra.mxu0 %v1560_v57  ;;  %1590 = vmatpush3.bf16.msra.mxu1 %v1560_v57 }
 0x255   : > { %1565 = vmatprep.subr.bf16.mxu0 %v1564_v61  ;;  %1587 = vmatprep.subr.bf16.mxu1 %v1564_v61 }
 0x258   : > { %1567 = vmatpush3.bf16.msra.mxu0 %v1564_v61  ;;  %1591 = vmatpush3.bf16.msra.mxu1 %v1564_v61 }
 0x25e   : > { %v1637_v4 = vpop.eup %1636 }
 0x25f   : > { %v1020_v0 = vmul.f32 %v1637_v4, %v1019_v59 }
 0x261   : > { %v1022_v5 = vmul.f32 %v1020_v0, %v1012_v40  ;;  %v1028_v6 = vrot.slane %v1020_v0, %v1964_v15  ;;  %v1385_v0 = vld [vmem:[#allocation6] ss:$0 sm:$0xff] }
 0x263   : > { %v1023_v42 = vsub.f32 %v1021_v1, %v1022_v5  ;;  %v1030_v9 = vmul.f32 %v1028_v6, %v930_v33  ;;  %v1034_v28 = vmul.f32 %v1028_v6, %v934_v34  ;;  %v1031_v43 = vmul.f32 %v1028_v6, %v931_v31 }
 0x264   : > { %v1035_v44 = vmul.f32 %v1028_v6, %v935_v32  ;;  %v1032_v47 = vmul.f32 %v1028_v6, %v932_v55  ;;  %v1036_v48 = vmul.f32 %v1028_v6, %v936_v62  ;;  %v1033_v29 = vmul.f32 %v1028_v6, %v933_v51 }
 0x265   : > { %v1042_v63 = vrot.slane %v1023_v42, %v1964_v15  ;;  %v1037_v30 = vmul.f32 %v1028_v6, %v937_v54 }
 0x267   : > { %v1044_v33 = vadd.f32 %v1042_v63, %v1030_v9  ;;  %v1048_v7 = vadd.f32 %v1042_v63, %v1034_v28  ;;  %v1045_v31 = vadd.f32 %v1042_v63, %v1031_v43  ;;  %v1049_v34 = vadd.f32 %v1042_v63, %v1035_v44 }
 0x268   : > { %v1046_v8 = vadd.f32 %v1042_v63, %v1032_v47  ;;  %v1050_v32 = vadd.f32 %v1042_v63, %v1036_v48  ;;  %v1047_v15 = vadd.f32 %v1042_v63, %v1033_v29  ;;  %v1051_v45 = vadd.f32 %v1042_v63, %v1037_v30 }
 0x269   : > { %1508 = vmatprep.mubr.msk.f32.mxu0 %vm535_vm1, %v1044_v33  ;;  %1514 = vmatprep.mubr.msk.f32.mxu1 %vm535_vm1, %v1048_v7 }
 0x26a   : > { %1509 = vmatmul.mubr.msk.f32.vlgmr.msra.gmra.mrb[0].mxu0 %vm535_vm1, %v1045_v31  ;;  %1515 = vmatmul.mubr.msk.f32.vlgmr.msra.gmra.mrb[0].mxu1 %vm535_vm1, %v1049_v34 }
 0x26b   : > { %1511 = vmatprep.mubr.msk.f32.mxu0 %vm535_vm1, %v1046_v8  ;;  %1517 = vmatprep.mubr.msk.f32.mxu1 %vm535_vm1, %v1050_v32 }
 0x26e   : > { %1512 = vmatmul.mubr.msk.f32.gmra.mrb[2].mxu0 %vm535_vm1, %v1047_v15  ;;  %1518 = vmatmul.mubr.msk.f32.gmra.mrb[2].mxu1 %vm535_vm1, %v1051_v45 }
 0x33d   : > { %v1510_v49 = vpop.f32.mrb[0].mxu0  ;;  %v1516_v50 = vpop.f32.mrb[0].mxu1 }
 0x33e   : > { %v1163_v51 = vadd.f32 %v1510_v49, %v1375_v46  ;;  %v1183_v54 = vadd.f32 %v1516_v50, %v1375_v46  ;;  %v1157_v55 = vpop.f32.mrb[1].mxu0  ;;  %v1177_v62 = vpop.f32.mrb[1].mxu1 }
 0x33f   : > { %v1158_v2 = vadd.f32 %v1375_v46, %v1157_v55  ;;  %v1178_v3 = vadd.f32 %v1375_v46, %v1177_v62 }
 0x340   : > { %v1197_v12 = vmax.f32 %v1163_v51, 0.0  ;;  %v1201_v13 = vmax.f32 %v1183_v54, 0.0 }
 0x341   : > { %v1196_v14 = vmax.f32 %v1158_v2, 0.0  ;;  %v1513_v35 = vpop.f32.mrb[2].mxu0  ;;  %v1519_v16 = vpop.f32.mrb[2].mxu1  ;;  %v1200_v20 = vmax.f32 %v1178_v3, 0.0 }
 0x342   : > { %v1173_v36 = vadd.f32 %v1513_v35, %v1375_v46  ;;  %v1167_v17 = vpop.f32.mrb[3].mxu0  ;;  %v1216_v18 = vmul.f32 %v1384_v11, %v1201_v13  ;;  %v1212_v37 = vmul.f32 %v1384_v11, %v1197_v12  ;;  %v1193_v38 = vadd.f32 %v1519_v16, %v1375_v46  ;;  %v1187_v19 = vpop.f32.mrb[3].mxu1 }
 0x343   : > { %v1168_v21 = vadd.f32 %v1375_v46, %v1167_v17  ;;  %v1188_v22 = vadd.f32 %v1375_v46, %v1187_v19  ;;  %v1211_v24 = vmul.f32 %v1384_v11, %v1196_v14  ;;  %v1215_v60 = vmul.f32 %v1384_v11, %v1200_v20 }
 0x344   : > { %v1199_v39 = vmax.f32 %v1173_v36, 0.0  ;;  %v1234_v23 = vsel %vm535_vm1, %v1216_v18, 0.0  ;;  %v1222_v10 = vsel %vm535_vm1, %v1212_v37, 0.0  ;;  %v1203_v26 = vmax.f32 %v1193_v38, 0.0 }
 0x345   : > { %v1198_v25 = vmax.f32 %v1168_v21, 0.0  ;;  %1235 = vadd.xlane.f32.xlu1 %v1234_v23  ;;  %1223 = vadd.xlane.f32.xlu0 %v1222_v10  ;;  %v1202_v40 = vmax.f32 %v1188_v22, 0.0  ;;  %v1219_v57 = vsel %vm535_vm1, %v1211_v24, 0.0  ;;  %v1231_v53 = vsel %vm535_vm1, %v1215_v60, 0.0 }
 0x346   : > { %v1214_v27 = vmul.f32 %v1384_v11, %v1199_v39  ;;  %v1218_v52 = vmul.f32 %v1384_v11, %v1203_v26 }
 0x347   : > { %v1213_v41 = vmul.f32 %v1384_v11, %v1198_v25  ;;  %v1217_v58 = vmul.f32 %v1384_v11, %v1202_v40 }
 0x348   : > { %v1228_v56 = vsel %vm535_vm1, %v1214_v27, 0.0  ;;  %v1240_v59 = vsel %vm535_vm1, %v1218_v52, 0.0 }
 0x349   : > { %1229 = vadd.xlane.f32.xlu1 %v1228_v56  ;;  %1220 = vadd.xlane.f32.xlu0 %v1219_v57  ;;  %v1225_v61 = vsel %vm535_vm1, %v1213_v41, 0.0  ;;  %v1237_v4 = vsel %vm535_vm1, %v1217_v58, 0.0 }
 0x34d   : > { %1226 = vadd.xlane.f32.xlu1 %v1225_v61  ;;  %1232 = vadd.xlane.f32.xlu0 %v1231_v53 }
 0x351   : > { %1241 = vadd.xlane.f32.xlu1 %v1240_v59  ;;  %1238 = vadd.xlane.f32.xlu0 %v1237_v4 }
 0x3d2   : > { %v1236_v1 = vpop.xlane.xlu1 %1235  ;;  %v1224_v5 = vpop.xlane.xlu0 %1223 }
 0x3d3   : > { %v1255_v6 = vadd.f32 %v1385_v0, %v1236_v1  ;;  %v1251_v42 = vadd.f32 %v1385_v0, %v1224_v5 }
 0x3d5   : > { %1264 = vst.msk [vmem:[%s1798_s23 + $0x28] sm:$0xff] %vm1258_vm12, %v1255_v6  ;;  %1260 = vst.msk [vmem:[%s1798_s23 + $0x8] sm:$0xff] %vm1258_vm12, %v1251_v42 }
 0x3d6   : > { %v1230_v9 = vpop.xlane.xlu1 %1229  ;;  %v1221_v28 = vpop.xlane.xlu0 %1220 }
 0x3d7   : > { %v1253_v43 = vadd.f32 %v1385_v0, %v1230_v9  ;;  %v1250_v44 = vadd.f32 %v1385_v0, %v1221_v28 }
 0x3d9   : > { %1262 = vst.msk [vmem:[%s1798_s23 + $0x18] sm:$0xff] %vm1258_vm12, %v1253_v43  ;;  %1259 = vst.msk [vmem:[%s1798_s23] sm:$0xff] %vm1258_vm12, %v1250_v44 }
 0x3da   : > { %v1227_v47 = vpop.xlane.xlu1 %1226  ;;  %v1233_v48 = vpop.xlane.xlu0 %1232 }
 0x3db   : > { %v1252_v63 = vadd.f32 %v1385_v0, %v1227_v47  ;;  %v1254_v29 = vadd.f32 %v1385_v0, %v1233_v48 }
 0x3dd   : > { %1261 = vst.msk [vmem:[%s1798_s23 + $0x10] sm:$0xff] %vm1258_vm12, %v1252_v63  ;;  %1263 = vst.msk [vmem:[%s1798_s23 + $0x20] sm:$0xff] %vm1258_vm12, %v1254_v29 }
 0x3de   : > { %v1242_v30 = vpop.xlane.xlu1 %1241  ;;  %v1239_v33 = vpop.xlane.xlu0 %1238 }
 0x3df   : > { %v1257_v7 = vadd.f32 %v1385_v0, %v1242_v30  ;;  %v1256_v31 = vadd.f32 %v1385_v0, %v1239_v33 }
 0x3e1   : > { %1266 = vst.msk [vmem:[%s1798_s23 + $0x38] sm:$0xff] %vm1258_vm12, %v1257_v7  ;;  %1265 = vst.msk [vmem:[%s1798_s23 + $0x30] sm:$0xff] %vm1258_vm12, %v1256_v31 }
 0x3e2 PF: > { %s25_s14 = sadd.s32 1, %s1676_s14   ;;  %s2181_s27 = smov %s1668_s29 }
 0x3e3   : > { %p22_p13 = scmp.ge.s32.totalorder %s25_s14, 14   ;;  %s2182_s28 = smov %s1672_s30 }
 0x3e4   : > { %s2183_s29 = smov %s2186_s12  ;;  %s2184_s30 = smov %s2190_s15 }
 0x3e5   :  { %24 = sbr.rel (!%p22_p13) target bundleno = 3 (0x3), region = 122 }

</bundles_post_ra>
